<compile_context>
chip_gen: v5e
topology: v5e:2x2
jax: 0.10.0
libtpu: 0.0.40
codegen_flags: <defaults>
</compile_context>

<pallas_src>
import jax
import jax.numpy as jnp
from jax import lax
from jax.experimental import pallas as pl
from jax.experimental.pallas import tpu as pltpu


# ----------------------------------------------------------------------------
# Tiling helpers
# ----------------------------------------------------------------------------
_COMPILER_PARAMS = pltpu.CompilerParams(
    dimension_semantics=("parallel",),
    vmem_limit_bytes=32 * 1024 * 1024,   # safe on v5e/v6e (128 MiB) and v7x (64 MiB)
)

_TM_MATMUL = 512   # row cap for MXU-containing kernels
_TM_REDUCE = 512   # row cap for memory-bound reduce kernels


def _tile_rows(M, cap):
    """Single block when M fits the cap (grid steps are a sequential loop on
    single-TensorCore chips, so never force a split); otherwise cap-sized
    tiles (cap is a multiple of 8) with a masked partial last block."""
    return M if M <= cap else cap


def _make_pool_matrix(H, W, dtype=jnp.bfloat16):
    """2x2/stride-2 average-pooling as a (Ho*Wo, H*W) matrix (0.25 entries).
    Floors odd H/W like nn.AvgPool2d(2, 2)."""
    Ho, Wo = H // 2, W // 2
    p = jnp.arange(H * W)
    y, x = p // W, p % W
    o_of_p = (y // 2) * Wo + (x // 2)
    valid = (y < 2 * Ho) & (x < 2 * Wo)
    o = jnp.arange(Ho * Wo)
    m = (o[:, None] == o_of_p[None, :]) & valid[None, :]
    return (m * 0.25).astype(dtype)


# ----------------------------------------------------------------------------
# Pallas kernels
# ----------------------------------------------------------------------------
def _matmul_bn_relu_kernel(x_ref, w_ref, s_ref, t_ref, o_ref):
    # stem: relu(BN(conv0(x)))  (conv as im2col patches @ w, BN folded).
    z = jnp.dot(x_ref[...].astype(jnp.bfloat16), w_ref[...],
                preferred_element_type=jnp.float32)
    o_ref[...] = jnp.maximum(z * s_ref[...] + t_ref[...], 0.0).astype(o_ref.dtype)


def _bn_relu_matmul_kernel(x_ref, s_ref, t_ref, w_ref, o_ref):
    # CAM (per-pixel classifier on relu(norm5(x))): relu(x*s+t) @ w.
    h = jnp.maximum(x_ref[...].astype(jnp.float32) * s_ref[...] + t_ref[...], 0.0)
    o_ref[...] = jnp.dot(h.astype(jnp.bfloat16), w_ref[...],
                         preferred_element_type=jnp.float32).astype(o_ref.dtype)


def _reduce_max_kernel(x_ref, o_ref):
    # maxpool0: max over the leading 9-tap window axis.
    o_ref[...] = jnp.max(x_ref[...].astype(jnp.float32), axis=0).astype(o_ref.dtype)


def _transition_kernel(x_ref, s_ref, t_ref, p_ref, w_ref, o_ref):
    # transition: relu(bn(x)) -> 2x2 avg pool (as a matmul, pooling commutes
    # with the 1x1 conv) -> 1x1 conv on 4x fewer rows.  One kernel, one HBM
    # read of x and one quarter-size HBM write.
    _, H, W, C = x_ref.shape
    Ho, Wo, Co = o_ref.shape[1], o_ref.shape[2], o_ref.shape[3]
    xf = x_ref[0].reshape(H * W, C).astype(jnp.float32)
    h = jnp.maximum(xf * s_ref[...] + t_ref[...], 0.0).astype(jnp.bfloat16)
    pooled = jnp.dot(p_ref[...], h, preferred_element_type=jnp.float32)
    y = jnp.dot(pooled.astype(jnp.bfloat16), w_ref[...],
                preferred_element_type=jnp.float32)
    o_ref[0] = y.reshape(Ho, Wo, Co).astype(o_ref.dtype)


def _gap_bn_relu_kernel(x_ref, s_ref, t_ref, o_ref):
    # adaptive avg-pool fused with the final BN (norm5) + ReLU, per batch image.
    h = jnp.maximum(x_ref[0].astype(jnp.float32) * s_ref[...] + t_ref[...], 0.0)
    o_ref[0] = jnp.mean(h, axis=0, keepdims=True)


def _linear_sigmoid_kernel(x_ref, w_ref, b_ref, o_ref):
    z = jnp.dot(x_ref[...].astype(jnp.bfloat16), w_ref[...],
                preferred_element_type=jnp.float32) + b_ref[...]
    o_ref[...] = 1.0 / (1.0 + jnp.exp(-z))


def _make_dense_block_kernel(H, W, C0, G, Cb, L):
    """One kernel per dense block: every layer (BN1+ReLU1 -> 1x1 conv ->
    BN2+ReLU2 -> 3x3 conv) is fused, the growing channel buffer lives in the
    output VMEM block, and only the final (C0 + L*G)-wide block is written to
    HBM once.  The 3x3 conv is 9 whole-image dots on a zero-padded scratch."""
    def kernel(*refs):
        x_ref = refs[0]
        p = refs[1:1 + 6 * L]
        o_ref = refs[1 + 6 * L]
        pad_ref = refs[2 + 6 * L]

        o_ref[0, :, :, 0:C0] = x_ref[0]
        pad_ref[...] = jnp.zeros_like(pad_ref)          # borders stay zero

        for li in range(L):
            c_in = C0 + li * G
            n1s, n1t, w1, n2s, n2t, w2 = p[6 * li:6 * li + 6]

            # BN1 + ReLU1 -> 1x1 conv -> BN2 + ReLU2 (f32 math, bf16 dots)
            xf = o_ref[0, :, :, 0:c_in].reshape(H * W, c_in).astype(jnp.float32)
            h = jnp.maximum(xf * n1s[...] + n1t[...], 0.0)
            z = jnp.dot(h.astype(jnp.bfloat16), w1[...],
                        preferred_element_type=jnp.float32)
            h2 = jnp.maximum(z * n2s[...] + n2t[...], 0.0).astype(jnp.bfloat16)

            # 3x3 conv (stride 1, pad 1): 9 whole-image dots, f32 accumulator.
            pad_ref[1:H + 1, 1:W + 1, :] = h2.reshape(H, W, Cb)
            acc = jnp.zeros((H * W, G), jnp.float32)
            for t in range(9):
                di, dj = t // 3, t % 3
                xs = pad_ref[di:di + H, dj:dj + W, :].reshape(H * W, Cb)
                acc = acc + jnp.dot(xs, w2[t], preferred_element_type=jnp.float32)

            # Append the G new channels into the wide channel buffer.
            o_ref[0, :, :, c_in:c_in + G] = acc.reshape(H, W, G).astype(o_ref.dtype)
    return kernel


# ----------------------------------------------------------------------------
# Pallas wrappers
# ----------------------------------------------------------------------------
def pallas_stem_conv(patches, w, scale, shift):
    # TODO(synk): direct stride-2 7x7 stem conv (drop im2col); pad K=147 on v5e.
    M, K = patches.shape
    N = w.shape[1]
    TM = _tile_rows(M, _TM_MATMUL)
    return pl.pallas_call(
        _matmul_bn_relu_kernel,
        out_shape=jax.ShapeDtypeStruct((M, N), jnp.bfloat16),
        grid=(pl.cdiv(M, TM),),
        in_specs=[pl.BlockSpec((TM, K), lambda i: (i, 0)),
                  pl.BlockSpec((K, N), lambda i: (0, 0)),
                  pl.BlockSpec((1, N), lambda i: (0, 0)),
                  pl.BlockSpec((1, N), lambda i: (0, 0))],
        out_specs=pl.BlockSpec((TM, N), lambda i: (i, 0)),
        compiler_params=_COMPILER_PARAMS,
    )(patches, w, scale.reshape(1, N), shift.reshape(1, N))


def pallas_reduce_max(x):
    K, M, C = x.shape
    TM = _tile_rows(M, _TM_REDUCE)
    return pl.pallas_call(
        _reduce_max_kernel,
        out_shape=jax.ShapeDtypeStruct((M, C), x.dtype),
        grid=(pl.cdiv(M, TM),),
        in_specs=[pl.BlockSpec((K, TM, C), lambda i: (0, i, 0))],
        out_specs=pl.BlockSpec((TM, C), lambda i: (i, 0)),
        compiler_params=_COMPILER_PARAMS,
    )(x)


def pallas_dense_block(x, layers):
    """x: (B, H, W, C0) bf16; layers: list of per-layer param dicts.
    Returns (B, H, W, C0 + L*G) bf16."""
    B, H, W, C0 = x.shape
    L = len(layers)
    Cb, G = layers[0]['conv2_w'].shape[1], layers[0]['conv2_w'].shape[2]
    c_out = C0 + L * G
    kernel = _make_dense_block_kernel(H, W, C0, G, Cb, L)

    operands = [x]
    in_specs = [pl.BlockSpec((1, H, W, C0), lambda b: (b, 0, 0, 0))]
    for li, lp in enumerate(layers):
        c_in = C0 + li * G
        operands += [lp['n1_scale'].reshape(1, c_in), lp['n1_shift'].reshape(1, c_in),
                     lp['conv1_w'],
                     lp['n2_scale'].reshape(1, Cb), lp['n2_shift'].reshape(1, Cb),
                     lp['conv2_w']]
        in_specs += [pl.BlockSpec((1, c_in), lambda b: (0, 0)),
                     pl.BlockSpec((1, c_in), lambda b: (0, 0)),
                     pl.BlockSpec((c_in, Cb), lambda b: (0, 0)),
                     pl.BlockSpec((1, Cb), lambda b: (0, 0)),
                     pl.BlockSpec((1, Cb), lambda b: (0, 0)),
                     pl.BlockSpec((9, Cb, G), lambda b: (0, 0, 0))]

    # TODO(synk): halo-tiled spatial grid for large H*W (v7x 64 MiB VMEM).
    return pl.pallas_call(
        kernel,
        out_shape=jax.ShapeDtypeStruct((B, H, W, c_out), jnp.bfloat16),
        grid=(B,),
        in_specs=in_specs,
        out_specs=pl.BlockSpec((1, H, W, c_out), lambda b: (b, 0, 0, 0)),
        scratch_shapes=[pltpu.VMEM((H + 2, W + 2, Cb), jnp.bfloat16)],
        compiler_params=_COMPILER_PARAMS,
    )(*operands)


def pallas_transition(x, tp):
    B, H, W, C = x.shape
    Co = tp['conv_w'].shape[1]
    Ho, Wo = H // 2, W // 2
    P = _make_pool_matrix(H, W)                       # (Ho*Wo, H*W) bf16
    return pl.pallas_call(
        _transition_kernel,
        out_shape=jax.ShapeDtypeStruct((B, Ho, Wo, Co), jnp.bfloat16),
        grid=(B,),
        in_specs=[pl.BlockSpec((1, H, W, C), lambda b: (b, 0, 0, 0)),
                  pl.BlockSpec((1, C), lambda b: (0, 0)),
                  pl.BlockSpec((1, C), lambda b: (0, 0)),
                  pl.BlockSpec((Ho * Wo, H * W), lambda b: (0, 0)),
                  pl.BlockSpec((C, Co), lambda b: (0, 0))],
        out_specs=pl.BlockSpec((1, Ho, Wo, Co), lambda b: (b, 0, 0, 0)),
        compiler_params=_COMPILER_PARAMS,
    )(x, tp['scale'].reshape(1, C), tp['shift'].reshape(1, C), P, tp['conv_w'])


def pallas_gap_bn_relu(x, scale, shift):
    B, H, W, C = x.shape
    x2 = x.reshape(B, H * W, C)
    out = pl.pallas_call(
        _gap_bn_relu_kernel,
        out_shape=jax.ShapeDtypeStruct((B, 1, C), jnp.float32),
        grid=(B,),
        in_specs=[pl.BlockSpec((1, H * W, C), lambda b: (b, 0, 0)),
                  pl.BlockSpec((1, C), lambda b: (0, 0)),
                  pl.BlockSpec((1, C), lambda b: (0, 0))],
        out_specs=pl.BlockSpec((1, 1, C), lambda b: (b, 0, 0)),
        compiler_params=_COMPILER_PARAMS,
    )(x2, scale.reshape(1, C), shift.reshape(1, C))
    return out.reshape(B, C)


def pallas_bn_relu_matmul(x, scale, shift, w):
    M, C = x.shape
    N = w.shape[1]
    TM = _tile_rows(M, _TM_MATMUL)
    return pl.pallas_call(
        _bn_relu_matmul_kernel,
        out_shape=jax.ShapeDtypeStruct((M, N), jnp.float32),
        grid=(pl.cdiv(M, TM),),
        in_specs=[pl.BlockSpec((TM, C), lambda i: (i, 0)),
                  pl.BlockSpec((1, C), lambda i: (0, 0)),
                  pl.BlockSpec((1, C), lambda i: (0, 0)),
                  pl.BlockSpec((C, N), lambda i: (0, 0))],
        out_specs=pl.BlockSpec((TM, N), lambda i: (i, 0)),
        compiler_params=_COMPILER_PARAMS,
    )(x, scale.reshape(1, C), shift.reshape(1, C), w)


def pallas_linear_sigmoid(x, w, b):
    M, C = x.shape
    N = w.shape[1]
    TM = _tile_rows(M, _TM_MATMUL)
    return pl.pallas_call(
        _linear_sigmoid_kernel,
        out_shape=jax.ShapeDtypeStruct((M, N), jnp.float32),
        grid=(pl.cdiv(M, TM),),
        in_specs=[pl.BlockSpec((TM, C), lambda i: (i, 0)),
                  pl.BlockSpec((C, N), lambda i: (0, 0)),
                  pl.BlockSpec((1, N), lambda i: (0, 0))],
        out_specs=pl.BlockSpec((TM, N), lambda i: (i, 0)),
        compiler_params=_COMPILER_PARAMS,
    )(x, w, b.reshape(1, N))


# ----------------------------------------------------------------------------
# Pure-jnp reference backend (same bf16 rounding points) for verification.
# ----------------------------------------------------------------------------
def _bf16_dot(a, b):
    return jnp.dot(a.astype(jnp.bfloat16), b.astype(jnp.bfloat16),
                   preferred_element_type=jnp.float32)


def _jnp_stem_conv(p, w, s, t):
    return jnp.maximum(_bf16_dot(p, w) * s[None] + t[None], 0.0).astype(jnp.bfloat16)


def _jnp_reduce_max(x):
    return jnp.max(x.astype(jnp.float32), axis=0).astype(x.dtype)


def _jnp_dense_block(x, layers):
    B, H, W, _ = x.shape
    feats = x
    for lp in layers:
        c_in = feats.shape[-1]
        xf = feats.reshape(-1, c_in).astype(jnp.float32)
        h = jnp.maximum(xf * lp['n1_scale'][None] + lp['n1_shift'][None], 0.0)
        z = _bf16_dot(h, lp['conv1_w'])
        h2 = jnp.maximum(z * lp['n2_scale'][None] + lp['n2_shift'][None],
                         0.0).astype(jnp.bfloat16)
        Cb, G = lp['conv2_w'].shape[1], lp['conv2_w'].shape[2]
        hp = jnp.pad(h2.reshape(B, H, W, Cb), ((0, 0), (1, 1), (1, 1), (0, 0)))
        acc = jnp.zeros((B * H * W, G), jnp.float32)
        for t in range(9):
            di, dj = t // 3, t % 3
            xs = hp[:, di:di + H, dj:dj + W, :].reshape(-1, Cb)
            acc = acc + jnp.dot(xs, lp['conv2_w'][t], preferred_element_type=jnp.float32)
        feats = jnp.concatenate(
            [feats, acc.reshape(B, H, W, G).astype(jnp.bfloat16)], axis=-1)
    return feats


def _jnp_transition(x, tp):
    B, H, W, C = x.shape
    Co = tp['conv_w'].shape[1]
    Ho, Wo = H // 2, W // 2
    P = _make_pool_matrix(H, W)
    xf = x.reshape(B, H * W, C).astype(jnp.float32)
    h = jnp.maximum(xf * tp['scale'][None, None] + tp['shift'][None, None],
                    0.0).astype(jnp.bfloat16)
    pooled = jnp.einsum('ok,bkc->boc', P, h, preferred_element_type=jnp.float32)
    y = jnp.einsum('boc,cd->bod', pooled.astype(jnp.bfloat16), tp['conv_w'],
                   preferred_element_type=jnp.float32)
    return y.reshape(B, Ho, Wo, Co).astype(jnp.bfloat16)


def _jnp_gap_bn_relu(x, s, t):
    B, H, W, C = x.shape
    xf = x.reshape(B, H * W, C).astype(jnp.float32)
    return jnp.maximum(xf * s[None, None] + t[None, None], 0.0).mean(axis=1)


def _jnp_bn_relu_matmul(x, s, t, w):
    h = jnp.maximum(x.astype(jnp.float32) * s[None] + t[None], 0.0)
    return _bf16_dot(h, w)


def _jnp_linear_sigmoid(x, w, b):
    return 1.0 / (1.0 + jnp.exp(-(_bf16_dot(x, w) + b[None])))


OPS_PALLAS = dict(stem_conv=pallas_stem_conv, reduce_max=pallas_reduce_max,
                  dense_block=pallas_dense_block, transition=pallas_transition,
                  gap_bn_relu=pallas_gap_bn_relu, bn_relu_matmul=pallas_bn_relu_matmul,
                  linear_sigmoid=pallas_linear_sigmoid)
OPS_JNP = dict(stem_conv=_jnp_stem_conv, reduce_max=_jnp_reduce_max,
               dense_block=_jnp_dense_block, transition=_jnp_transition,
               gap_bn_relu=_jnp_gap_bn_relu, bn_relu_matmul=_jnp_bn_relu_matmul,
               linear_sigmoid=_jnp_linear_sigmoid)


# ----------------------------------------------------------------------------
# Glue: im2col (stem only) and maxpool0 window extraction
# ----------------------------------------------------------------------------
def im2col(x, kh, kw, stride, pad):
    """x: NHWC -> (B*Ho*Wo, kh*kw*C) with (i, j, c) ordering along last axis."""
    B, H, W, C = x.shape
    if pad > 0:
        x = jnp.pad(x, ((0, 0), (pad, pad), (pad, pad), (0, 0)))
    Ho = (H + 2 * pad - kh) // stride + 1
    Wo = (W + 2 * pad - kw) // stride + 1
    cols = []
    for i in range(kh):
        for j in range(kw):
            cols.append(x[:, i:i + (Ho - 1) * stride + 1:stride,
                          j:j + (Wo - 1) * stride + 1:stride, :])
    patches = jnp.stack(cols, axis=3)            # (B, Ho, Wo, kh*kw, C)
    return patches.reshape(B * Ho * Wo, kh * kw * C), Ho, Wo


def maxpool_3x3_s2_p1(x, ops):
    # TODO(synk): fold window extraction into the reduce kernel (stem runs once).
    B, H, W, C = x.shape
    xp = jnp.pad(x, ((0, 0), (1, 1), (1, 1), (0, 0)), constant_values=-jnp.inf)
    Ho = (H - 1) // 2 + 1
    Wo = (W - 1) // 2 + 1
    cols = [xp[:, i:i + (Ho - 1) * 2 + 1:2, j:j + (Wo - 1) * 2 + 1:2, :]
            for i in range(3) for j in range(3)]
    stacked = jnp.stack(cols, axis=0).reshape(9, B * Ho * Wo, C)
    return ops['reduce_max'](stacked).reshape(B, Ho, Wo, C)


# ----------------------------------------------------------------------------
# DenseNet forward
# ----------------------------------------------------------------------------
def densenet_forward(params, x_nchw, ops):
    x = jnp.transpose(x_nchw, (0, 2, 3, 1)).astype(jnp.float32)   # NCHW -> NHWC
    B = x.shape[0]

    # stem: conv0(7x7/2,p3)+norm0+relu0 fused into one kernel, then maxpool0.
    patches, Ho, Wo = im2col(x, 7, 7, 2, 3)
    y = ops['stem_conv'](patches, params['conv0_w'],
                         params['norm0_scale'], params['norm0_shift'])
    x = maxpool_3x3_s2_p1(y.reshape(B, Ho, Wo, -1), ops)

    # dense blocks: one fused kernel per block; transitions are one kernel.
    for blk in params['blocks']:
        x = ops['dense_block'](x, blk['layers'])
        if blk['transition'] is not None:
            x = ops['transition'](x, blk['transition'])

    # norm5 + the forward's F.relu are fused into both consumers.
    B_, H_, W_, C_ = x.shape
    n5s, n5t = params['norm5_scale'], params['norm5_shift']

    pooled = ops['gap_bn_relu'](x, n5s, n5t)                        # (B, C)
    cls_score = ops['linear_sigmoid'](pooled, params['cls_w'], params['cls_b'])

    # CAM: per-pixel classifier on relu(norm5(x)) (bias cancels) -> (B, cls, H, W)
    cam = ops['bn_relu_matmul'](x.reshape(-1, C_), n5s, n5t, params['cls_w'])
    cam = jnp.transpose(cam.reshape(B_, H_, W_, -1), (0, 3, 1, 2))

    grad_cams = []  # TODO(synk): grad-CAM (backward hooks / autograd) not reproduced.
    return cls_score, cam, grad_cams


# ----------------------------------------------------------------------------
# Deterministic parameter construction (matching DenseNet.__init__ shapes/init)
# ----------------------------------------------------------------------------
def init_params(key, in_ch=3, growth_rate=8, block_config=(2, 2),
                num_init_features=16, bn_size=2, num_classes=10):
    eps = 1e-5
    keys = iter(jax.random.split(key, 256))

    def bn(c):
        gamma, beta = jnp.ones((c,), jnp.float32), jnp.zeros((c,), jnp.float32)
        rmean, rvar = jnp.zeros((c,), jnp.float32), jnp.ones((c,), jnp.float32)
        scale = gamma / jnp.sqrt(rvar + eps)
        return scale, beta - rmean * scale

    def kaiming(cout, cin, kh, kw):
        std = (2.0 / (cin * kh * kw)) ** 0.5
        return jax.random.normal(next(keys), (cout, cin, kh, kw), jnp.float32) * std

    params = {}
    w0 = kaiming(num_init_features, in_ch, 7, 7)                      # OIHW
    params['conv0_w'] = jnp.transpose(w0, (2, 3, 1, 0)).reshape(
        49 * in_ch, num_init_features).astype(jnp.bfloat16)
    params['norm0_scale'], params['norm0_shift'] = bn(num_init_features)

    nf = num_init_features
    blocks = []
    for bi, num_layers in enumerate(block_config):
        layers = []
        for li in range(num_layers):
            cin = nf + li * growth_rate
            cb = bn_size * growth_rate
            n1s, n1t = bn(cin)
            w1 = kaiming(cb, cin, 1, 1)
            n2s, n2t = bn(cb)
            w2 = kaiming(growth_rate, cb, 3, 3)                       # (G, Cb, 3, 3)
            layers.append({
                'n1_scale': n1s, 'n1_shift': n1t,
                'conv1_w': w1[:, :, 0, 0].T.astype(jnp.bfloat16),     # (cin, cb)
                'n2_scale': n2s, 'n2_shift': n2t,
                # OIHW -> (kh, kw, Cb, G) -> (9, Cb, G) tap-major (di*3+dj).
                'conv2_w': jnp.transpose(w2, (2, 3, 1, 0)).reshape(
                    9, cb, growth_rate).astype(jnp.bfloat16)})
        nf = nf + num_layers * growth_rate
        blk = {'layers': layers, 'transition': None}
        if bi != len(block_config) - 1:
            ts, tt = bn(nf)
            wt = kaiming(nf // 2, nf, 1, 1)
            blk['transition'] = {'scale': ts, 'shift': tt,
                                 'conv_w': wt[:, :, 0, 0].T.astype(jnp.bfloat16)}
            nf = nf // 2
        else:
            params['norm5_scale'], params['norm5_shift'] = bn(nf)
        blocks.append(blk)
    params['blocks'] = blocks

    bound = 1.0 / (nf ** 0.5)
    wc = jax.random.uniform(next(keys), (num_classes, nf), jnp.float32, -bound, bound)
    params['cls_w'] = wc.T.astype(jnp.bfloat16)                       # (C_final, classes)
    params['cls_b'] = jnp.zeros((num_classes,), jnp.float32)
    return params, nf


# ----------------------------------------------------------------------------
if __name__ == "__main__":
    key = jax.random.PRNGKey(0)
    (kp, kx, k1, k2, k3, k4, k5, k6, k7, k8, k9, k10) = jax.random.split(key, 12)

    # --- unit: fused BN+ReLU+matmul (odd M exercises a non-8-multiple block) ---
    x_u = jax.random.normal(k1, (37, 24), jnp.float32)
    s_u = jax.random.normal(k2, (24,), jnp.float32) * 0.1 + 1.0
    t_u = jax.random.normal(k3, (24,), jnp.float32) * 0.1
    w_u = (jax.random.normal(k4, (24, 16), jnp.float32) * 0.2).astype(jnp.bfloat16)
    got = pallas_bn_relu_matmul(x_u, s_u, t_u, w_u)
    ref = _jnp_bn_relu_matmul(x_u, s_u, t_u, w_u)
    assert bool(jnp.allclose(got, ref, atol=1e-2, rtol=1e-2))

    # --- unit: fused dense-block layer (identity bottleneck) vs f32 lax.conv ---
    Bu, Hu, Wu, C0u, Gu = 2, 16, 16, 16, 8
    x_c = jax.random.normal(k5, (Bu, Hu, Wu, C0u), jnp.float32)
    w_oihw = jax.random.normal(k6, (Gu, C0u, 3, 3), jnp.float32) * 0.1
    lp_u = {'n1_scale': jnp.ones((C0u,), jnp.float32),
            'n1_shift': jnp.zeros((C0u,), jnp.float32),
            'conv1_w': jnp.eye(C0u, dtype=jnp.bfloat16),
            'n2_scale': jnp.ones((C0u,), jnp.float32),
            'n2_shift': jnp.zeros((C0u,), jnp.float32),
            'conv2_w': jnp.transpose(w_oihw, (2, 3, 1, 0)).reshape(
                9, C0u, Gu).astype(jnp.bfloat16)}
    x_bf = x_c.astype(jnp.bfloat16)
    got_blk = pallas_dense_block(x_bf, [lp_u])
    assert got_blk.shape == (Bu, Hu, Wu, C0u + Gu)
    assert bool(jnp.allclose(got_blk[..., :C0u].astype(jnp.float32),
                             x_bf.astype(jnp.float32)))           # pass-through channels
    conv_ref = lax.conv_general_dilated(
        jnp.transpose(jnp.maximum(x_bf.astype(jnp.float32), 0.0), (0, 3, 1, 2)),
        w_oihw, (1, 1), [(1, 1), (1, 1)],
        dimension_numbers=('NCHW', 'OIHW', 'NCHW'))
    assert bool(jnp.allclose(
        jnp.transpose(got_blk[..., C0u:].astype(jnp.float32), (0, 3, 1, 2)),
        conv_ref, atol=1e-1, rtol=1e-1))            # loose: bf16 vs f32 conv

    # --- unit: fused transition (pool-then-conv) vs f32 conv-then-pool --------
    C_t, Co_t = 32, 16
    x_t = jax.random.normal(k7, (2, 16, 16, C_t), jnp.float32).astype(jnp.bfloat16)
    s_t = jax.random.normal(k8, (C_t,), jnp.float32) * 0.1 + 1.0
    t_t = jax.random.normal(k9, (C_t,), jnp.float32) * 0.1
    w_t = (jax.random.normal(k10, (C_t, Co_t), jnp.float32) * 0.2).astype(jnp.bfloat16)
    got_t = pallas_transition(x_t, {'scale': s_t, 'shift': t_t, 'conv_w': w_t})
    h_t = jnp.maximum(x_t.astype(jnp.float32) * s_t + t_t, 0.0)
    y_t = jnp.dot(h_t.reshape(-1, C_t), w_t.astype(jnp.float32)).reshape(2, 16, 16, Co_t)
    ref_t = y_t.reshape(2, 8, 2, 8, 2, Co_t).mean(axis=(2, 4))
    assert bool(jnp.allclose(got_t.astype(jnp.float32), ref_t, atol=5e-2, rtol=5e-2))

    # --- build a small DenseNet and run the full forward -----------------------
    params, c_final = init_params(kp, in_ch=3, growth_rate=8, block_config=(2, 2),
                                  num_init_features=16, bn_size=2, num_classes=10)
    x = jax.random.normal(kx, (2, 3, 64, 64), jnp.float32)

    fwd_pallas = jax.jit(lambda p, xi: densenet_forward(p, xi, OPS_PALLAS))
    fwd_ref = jax.jit(lambda p, xi: densenet_forward(p, xi, OPS_JNP))

    cls_score, cam, grad_cams = fwd_pallas(params, x)
    jax.block_until_ready((cls_score, cam))

    cls_ref, cam_ref, _ = fwd_ref(params, x)
    assert cls_score.shape == (2, 10) and cam.shape == (2, 10, 8, 8)
    assert bool(jnp.all(jnp.isfinite(cls_score))) and bool(jnp.all(jnp.isfinite(cam)))
    assert bool(jnp.allclose(cls_score, cls_ref, atol=2e-2, rtol=2e-2))
    assert bool(jnp.allclose(cam, cam_ref, atol=2e-2, rtol=2e-2))

    print("KERNEL_OK")
</pallas_src>

<mosaic_0001>
module attributes {stable_mosaic.version = 11 : i64} {
  func.func @_bn_relu_matmul_kernel(%arg0: i32, %arg1: memref<37x24xf32, #tpu.memory_space<vmem>>, %arg2: memref<1x24xf32, #tpu.memory_space<vmem>>, %arg3: memref<1x24xf32, #tpu.memory_space<vmem>>, %arg4: memref<24x16xbf16, #tpu.memory_space<vmem>>, %arg5: memref<37x16xf32, #tpu.memory_space<vmem>>) attributes {dimension_semantics = [#tpu.dimension_semantics<parallel>], iteration_bounds = array<i64: 1>, scalar_prefetch = 0 : i64, scratch_operands = 0 : i64, tpu.core_type = #tpu.core_type<tc>, window_params = [{transform_indices = @transform_0, window_bounds = array<i64: 37, 24>}, {pipeline_mode = #tpu.pipeline_mode<synchronous>, transform_indices = @transform_1, window_bounds = array<i64: 1, 24>}, {pipeline_mode = #tpu.pipeline_mode<synchronous>, transform_indices = @transform_2, window_bounds = array<i64: 1, 24>}, {pipeline_mode = #tpu.pipeline_mode<synchronous>, transform_indices = @transform_3, window_bounds = array<i64: 24, 16>}, {transform_indices = @transform_4, window_bounds = array<i64: 37, 16>}]} {
    %c0 = arith.constant 0 : index
    %c0_0 = arith.constant 0 : index
    %0 = vector.load %arg1[%c0, %c0_0] : memref<37x24xf32, #tpu.memory_space<vmem>>, vector<37x24xf32>
    %c0_1 = arith.constant 0 : index
    %c0_2 = arith.constant 0 : index
    %1 = vector.load %arg2[%c0_1, %c0_2] : memref<1x24xf32, #tpu.memory_space<vmem>>, vector<1x24xf32>
    %2 = vector.broadcast %1 : vector<1x24xf32> to vector<37x24xf32>
    %3 = arith.mulf %0, %2 : vector<37x24xf32>
    %c0_3 = arith.constant 0 : index
    %c0_4 = arith.constant 0 : index
    %4 = vector.load %arg3[%c0_3, %c0_4] : memref<1x24xf32, #tpu.memory_space<vmem>>, vector<1x24xf32>
    %5 = vector.broadcast %4 : vector<1x24xf32> to vector<37x24xf32>
    %6 = arith.addf %3, %5 : vector<37x24xf32>
    %cst = arith.constant 0.000000e+00 : f32
    %7 = vector.broadcast %cst : f32 to vector<37x24xf32>
    %8 = arith.maximumf %6, %7 : vector<37x24xf32>
    %9 = arith.truncf %8 : vector<37x24xf32> to vector<37x24xbf16>
    %c0_5 = arith.constant 0 : index
    %c0_6 = arith.constant 0 : index
    %10 = vector.load %arg4[%c0_5, %c0_6] : memref<24x16xbf16, #tpu.memory_space<vmem>>, vector<24x16xbf16>
    %cst_7 = arith.constant dense<0.000000e+00> : vector<37x16xf32>
    %11 = tpu.matmul %9, %10, %cst_7 {dimension_numbers = #tpu.dot_dimension_numbers<[1], [0], [0], [1], [0, 0, 1, 1], [], []>} : vector<37x24xbf16>, vector<24x16xbf16>, vector<37x16xf32> -> vector<37x16xf32>
    %c0_8 = arith.constant 0 : index
    %c0_9 = arith.constant 0 : index
    %12 = vector.load %arg5[%c0_8, %c0_9] : memref<37x16xf32, #tpu.memory_space<vmem>>, vector<37x16xf32>
    tpu.vector_store %arg5[%c0_8, %c0_9], %11 {strides = array<i32>} : memref<37x16xf32, #tpu.memory_space<vmem>>, vector<37x16xf32>,
    return
  }
  func.func @transform_0(%arg0: i32) -> (i32, i32) {
    %c0_i32 = arith.constant 0 : i32
    %c0_i32_0 = arith.constant 0 : i32
    return %arg0, %c0_i32 : i32, i32
  }
  func.func @transform_1(%arg0: i32) -> (i32, i32) {
    %c0_i32 = arith.constant 0 : i32
    %c0_i32_0 = arith.constant 0 : i32
    %c0_i32_1 = arith.constant 0 : i32
    return %c0_i32, %c0_i32_0 : i32, i32
  }
  func.func @transform_2(%arg0: i32) -> (i32, i32) {
    %c0_i32 = arith.constant 0 : i32
    %c0_i32_0 = arith.constant 0 : i32
    %c0_i32_1 = arith.constant 0 : i32
    return %c0_i32, %c0_i32_0 : i32, i32
  }
  func.func @transform_3(%arg0: i32) -> (i32, i32) {
    %c0_i32 = arith.constant 0 : i32
    %c0_i32_0 = arith.constant 0 : i32
    %c0_i32_1 = arith.constant 0 : i32
    return %c0_i32, %c0_i32_0 : i32, i32
  }
  func.func @transform_4(%arg0: i32) -> (i32, i32) {
    %c0_i32 = arith.constant 0 : i32
    %c0_i32_0 = arith.constant 0 : i32
    return %arg0, %c0_i32 : i32, i32
  }
}

</mosaic_0001>

<bundles_post_ra>
// kernel: tpu_custom_call.1
= control target key start
LH: loop header
LB: loop body
LE: loop exit
PB: predicated region body
PF: predicated region fallthrough
CT: control target
= control target key end

     0   :  { %vm71_vm0 = vcmask 1043456   ;;  %vm61_vm1 = vcmask 195584   ;;  %vm98_vm2 = vcmask 130048   ;;  %vm103_vm3 = vcmask 126976   ;;  %s190_s3 = inlined_call_operand.vmem [shape: bf16[24,16], index: 3, kind: input, shape index: {}]   ;;  %s191_s0 = inlined_call_operand.vmem [shape: f32[37,24], index: 0, kind: input, shape index: {}]   ;;  %s192_s1 = inlined_call_operand.vmem [shape: f32[1,24], index: 1, kind: input, shape index: {}]   ;;  %s193_s2 = inlined_call_operand.vmem [shape: f32[1,24], index: 2, kind: input, shape index: {}]   ;;  %s194_s4 = inlined_call_operand.vmem [shape: f32[37,16], index: 4, kind: output, shape index: {}]  }
   0x1   :  { %v51_v0 = vld [vmem:[%s190_s3 + $0x8] sm:$0xf]  ;;  %v18_v1 = vld [vmem:[%s191_s0] sm:$0xff]  ;;  %v20_v6 = vld [vmem:[%s191_s0 + $0x10] sm:$0xff] }
   0x2   :  { %v57_v2 = vunpack.c.l.b16 %v51_v0  ;;  %v19_v3 = vld [vmem:[%s191_s0 + $0x8] sm:$0xff]  ;;  %v121_v4 = vld [vmem:[%s192_s1] ss:$0 sm:$0xff]  ;;  %v21_v10 = vld [vmem:[%s191_s0 + $0x18] sm:$0xff] }
   0x3   :  { %v122_v5 = vld [vmem:[%s193_s2] ss:$0 sm:$0xff]  ;;  %v27_v8 = vmul.f32 %v121_v4, %v18_v1  ;;  %v28_v9 = vmul.f32 %v121_v4, %v19_v3  ;;  %v29_v11 = vmul.f32 %v121_v4, %v20_v6  ;;  %v30_v13 = vmul.f32 %v121_v4, %v21_v10 }
   0x4   :  { %v59_v7 = vpack.c.b16 %v57_v2, %v57_v2  ;;  %v22_v12 = vld [vmem:[%s191_s0 + $0x20] sm:$0x1f] }
   0x5   :  { %v31_v14 = vmul.f32 %v121_v4, %v22_v12  ;;  %v36_v16 = vadd.f32 %v122_v5, %v27_v8  ;;  %v37_v17 = vadd.f32 %v122_v5, %v28_v9  ;;  %v38_v18 = vadd.f32 %v122_v5, %v29_v11  ;;  %v116_v19 = vld [vmem:[%s190_s3] sm:$0xff] }
   0x6   :  { %v73_v15 = vsel %vm71_vm0, %v59_v7, 0  ;;  %v39_v20 = vadd.f32 %v122_v5, %v30_v13 }
   0x7   :  { %81 = vmatpush.bf16.msra.mxu0 %v73_v15  ;;  %117 = vmatpush.bf16.msra.mxu1 %v73_v15  ;;  %v40_v21 = vadd.f32 %v122_v5, %v31_v14  ;;  %v41_v22 = vmax.f32 %v36_v16, 0.0  ;;  %v42_v23 = vmax.f32 %v37_v17, 0.0  ;;  %v43_v24 = vmax.f32 %v38_v18, 0.0 }
   0x8   :  { %118 = vmatpush.bf16.msra.mxu2 %v73_v15  ;;  %v44_v25 = vmax.f32 %v39_v20, 0.0 }
   0x9   :  { %v45_v26 = vmax.f32 %v40_v21, 0.0  ;;  %v46_v27 = vpack.c.bf16 %v42_v23, %v41_v22 }
   0xa   :  { %v47_v28 = vpack.c.bf16 %v44_v25, %v43_v24 }
   0xb   :  { %82 = vmatpush.bf16.msra.mxu0 %v116_v19  ;;  %119 = vmatpush.bf16.msra.mxu1 %v116_v19  ;;  %v48_v29 = vpack.c.bf16 %v45_v26, %v45_v26 }
   0xc   :  { %120 = vmatpush.bf16.msra.mxu2 %v116_v19 }
   0xe   :  { %113 = vmatmul.msk.bf16.vlgmr.msra.gmra.mxu0 %vm61_vm1, %v46_v27  ;;  %114 = vmatmul.msk.bf16.vlgmr.msra.gmra.mxu1 %vm61_vm1, %v47_v28 }
   0xf   :  { %115 = vmatmul.msk.bf16.vlgmr.msra.gmra.mxu2 %vm61_vm1, %v48_v29 }
  0x8b   :  { %v84_v30 = vpop.f32.mrf.mxu0  ;;  %v89_v31 = vpop.f32.mrf.mxu1 }
  0x8c   :  { %99 = vst.msk [vmem:[%s194_s4] sm:$0xff] %vm98_vm2, %v84_v30 }
  0x8d   :  { %101 = vst.msk [vmem:[%s194_s4 + $0x10] sm:$0xff] %vm98_vm2, %v89_v31 }
  0x92   :  { %v94_v32 = vpop.f32.mrf.mxu2 }
  0x93   :  { %104 = vst.msk [vmem:[%s194_s4 + $0x20] sm:$0x1f] %vm103_vm3, %v94_v32  ;;  %v86_v33 = vpop.f32.mrf.mxu0  ;;  %v91_v34 = vpop.f32.mrf.mxu1 }
  0x94   :  { %100 = vst.msk [vmem:[%s194_s4 + $0x8] sm:$0xff] %vm98_vm2, %v86_v33 }
  0x95   :  { %102 = vst.msk [vmem:[%s194_s4 + $0x18] sm:$0xff] %vm98_vm2, %v91_v34 }
  0x9a   :  { %v96_v35 = vpop.f32.mrf.mxu2 }

</bundles_post_ra>
